<compile_context>
chip_gen: v7x
topology: tpu7x:2x2x1
jax: 0.10.0
libtpu: 0.0.40
codegen_flags: <defaults>
</compile_context>

<pallas_src>
import jax
import jax.numpy as jnp
from jax.experimental import pallas as pl
from jax.experimental.pallas import tpu as pltpu


# ---------------------------------------------------------------------------
# Conv 3x3 (pad=1) + BatchNorm (eval-mode, folded) + ReLU
# Channel-major layout: activation (C, N, H, W); kernel computes
#   out[(Cout, M)] = relu( W[(Cout,9Cin)] @ patches[(9Cin, M)] * scale + shift )
# with M = N*H*W so the output (and the store path) is lane-dense.
# ---------------------------------------------------------------------------
def conv_bn_relu_kernel(p_ref, w_ref, scale_ref, shift_ref, o_ref):
    # p_ref: (9*Cin, M) f32, w_ref: (Cout, 9*Cin) bf16, scale/shift: (Cout, 1) f32
    y = jnp.dot(w_ref[...], p_ref[...].astype(jnp.bfloat16),
                preferred_element_type=jnp.float32)
    y = y * scale_ref[...] + shift_ref[...]
    o_ref[...] = jnp.maximum(y, 0.0)


def conv3x3_bn_relu(x_cm, layer):
    # x_cm: (Cin, N, H, W) float32.  layer: dict(w_mat bf16 (Cout,9Cin), scale, shift)
    # TODO(synk): BatchNorm2d uses eval-mode running statistics (folded at init);
    #             train-mode batch stats are not computed here.
    Cin, N, H, W = x_cm.shape
    Cout = layer['w_mat'].shape[0]
    M = N * H * W

    # im2col (glue: pure data movement; the matmul hot path runs in Pallas)
    xp = jnp.pad(x_cm, ((0, 0), (0, 0), (1, 1), (1, 1)))
    taps = [xp[:, :, dy:dy + H, dx:dx + W] for dy in range(3) for dx in range(3)]
    patches = jnp.stack(taps, axis=0).reshape(9 * Cin, M)   # row = tap*Cin + cin

    out = pl.pallas_call(
        conv_bn_relu_kernel,
        out_shape=jax.ShapeDtypeStruct((Cout, M), jnp.float32),
        grid_spec=pltpu.PrefetchScalarGridSpec(
            num_scalar_prefetch=0,
            grid=(1,),                       # whole problem in one grid step (tiny)
            in_specs=[
                pl.BlockSpec((9 * Cin, M), lambda i: (0, 0)),
                pl.BlockSpec((Cout, 9 * Cin), lambda i: (0, 0)),
                pl.BlockSpec((Cout, 1), lambda i: (0, 0)),
                pl.BlockSpec((Cout, 1), lambda i: (0, 0)),
            ],
            out_specs=pl.BlockSpec((Cout, M), lambda i: (0, 0)),
        ),
        compiler_params=pltpu.CompilerParams(dimension_semantics=("arbitrary",)),
    )(patches, layer['w_mat'], layer['scale'], layer['shift'])
    return out.reshape(Cout, N, H, W)


# ---------------------------------------------------------------------------
# Pooling glue (tiny reductions / data movement, plain JAX, channel-major layout)
# ---------------------------------------------------------------------------
def maxpool_cmajor(x, kh, kw):
    # MaxPool2d(kernel=(kh,kw), stride=(kh,kw)), floor mode (remainder dropped)
    C, N, H, W = x.shape
    Ho, Wo = H // kh, W // kw
    x = x[:, :, :Ho * kh, :Wo * kw]
    return x.reshape(C, N, Ho, kh, Wo, kw).max(axis=(3, 5))


def adaptive_avg_pool_cmajor(x, out_h, out_w):
    # nn.AdaptiveAvgPool2d((out_h, out_w)) bin formula (handles non-divisible sizes)
    C, N, H, W = x.shape
    rows = []
    for i in range(out_h):
        hs, he = (i * H) // out_h, -(-((i + 1) * H) // out_h)
        cols = []
        for j in range(out_w):
            ws, we = (j * W) // out_w, -(-((j + 1) * W) // out_w)
            cols.append(jnp.mean(x[:, :, hs:he, ws:we], axis=(2, 3)))   # (C, N)
        rows.append(jnp.stack(cols, axis=-1))                           # (C, N, out_w)
    return jnp.stack(rows, axis=2)                                      # (C, N, out_h, out_w)


def flatten_nchw(x_cm):
    # x_cm: (C, N, h, w) -> torch-style x.view(N, -1) on NCHW (c-major, then h, then w)
    C, N, h, w = x_cm.shape
    return jnp.transpose(x_cm, (1, 0, 2, 3)).reshape(N, C * h * w)


# ---------------------------------------------------------------------------
# MLP head: linear1 -> ReLU -> (Dropout, identity in eval) -> linear2 (fused)
# ---------------------------------------------------------------------------
def head_kernel(x_ref, w1_ref, b1_ref, w2_ref, b2_ref, o_ref):
    h = jnp.dot(x_ref[...].astype(jnp.bfloat16), w1_ref[...],
                preferred_element_type=jnp.float32) + b1_ref[...]
    h = jnp.maximum(h, 0.0)
    # TODO(synk): nn.Dropout(0.5) is identity in eval/inference mode (no RNG drop here).
    o_ref[...] = jnp.dot(h.astype(jnp.bfloat16), w2_ref[...],
                         preferred_element_type=jnp.float32) + b2_ref[...]


def mlp_head(x, head):
    B, F = x.shape
    H1 = head['w1_t'].shape[1]
    C = head['w2_t'].shape[1]
    return pl.pallas_call(
        head_kernel,
        out_shape=jax.ShapeDtypeStruct((B, C), jnp.float32),
        grid_spec=pltpu.PrefetchScalarGridSpec(
            num_scalar_prefetch=0,
            grid=(1,),
            in_specs=[
                pl.BlockSpec((B, F), lambda i: (0, 0)),
                pl.BlockSpec((F, H1), lambda i: (0, 0)),
                pl.BlockSpec((1, H1), lambda i: (0, 0)),
                pl.BlockSpec((H1, C), lambda i: (0, 0)),
                pl.BlockSpec((1, C), lambda i: (0, 0)),
            ],
            out_specs=pl.BlockSpec((B, C), lambda i: (0, 0)),
        ),
        compiler_params=pltpu.CompilerParams(dimension_semantics=("arbitrary",)),
    )(x, head['w1_t'], head['b1'], head['w2_t'], head['b2'])


# ---------------------------------------------------------------------------
# Parameter construction (deterministic, synthetic). BN folded; weights bf16.
# ---------------------------------------------------------------------------
def init_params(key, cfg, cfg_ts, n_units_ts, num_classes=100, eps=1e-5):
    def make_conv_stack(key, cfg_list, in_ch):
        layers = []
        for layer in cfg_list:
            if layer == 'M':
                layers.append('M')
                continue
            key, k1 = jax.random.split(key)
            cout = layer
            fan_out = cout * 9
            w = jax.random.normal(k1, (cout, in_ch, 3, 3), jnp.float32) * jnp.sqrt(2.0 / fan_out)
            b = jnp.zeros((cout,), jnp.float32)
            gamma = jnp.ones((cout,), jnp.float32)
            beta = jnp.zeros((cout,), jnp.float32)
            mean = jnp.zeros((cout,), jnp.float32)
            var = jnp.ones((cout,), jnp.float32)
            inv_std = 1.0 / jnp.sqrt(var + eps)
            # weight matrix ordered (cout) x (ky, kx, cin) to match patch rows (tap*Cin+cin)
            w_mat = jnp.transpose(w, (0, 2, 3, 1)).reshape(cout, 9 * in_ch).astype(jnp.bfloat16)
            scale = (gamma * inv_std).reshape(cout, 1)
            shift = (beta + (b - mean) * gamma * inv_std).reshape(cout, 1)
            layers.append(dict(w_mat=w_mat, scale=scale, shift=shift))
            in_ch = cout
        return key, layers

    key, cnn_layers = make_conv_stack(key, cfg, 1)
    key, ts_layers = make_conv_stack(key, cfg_ts, 1)

    key, k1, k2 = jax.random.split(key, 3)
    lim1 = 1.0 / jnp.sqrt(jnp.float32(n_units_ts))
    w1 = jax.random.uniform(k1, (512, n_units_ts), jnp.float32, -lim1, lim1)
    lim2 = 1.0 / jnp.sqrt(jnp.float32(512))
    w2 = jax.random.uniform(k2, (num_classes, 512), jnp.float32, -lim2, lim2)
    head = dict(w1_t=w1.T.astype(jnp.bfloat16),
                b1=jnp.zeros((1, 512), jnp.float32),
                w2_t=w2.T.astype(jnp.bfloat16),
                b2=jnp.zeros((1, num_classes), jnp.float32))
    return dict(cnn=cnn_layers, cnn_ts=ts_layers, head=head)


# ---------------------------------------------------------------------------
# Full forward pass (matches cnn_cnn.forward)
# ---------------------------------------------------------------------------
def cnn_cnn_forward(params, x_btchw):
    B, T, C, H, W = x_btchw.shape

    # ----- cnn stage on (B*T, C, H, W), channel-major layout (C, B*T, H, W)
    x = jnp.transpose(x_btchw.reshape(B * T, C, H, W), (1, 0, 2, 3))
    for layer in params['cnn']:
        if isinstance(layer, str):                 # 'M'
            x = maxpool_cmajor(x, 2, 2)
        else:
            x = conv3x3_bn_relu(x, layer)
    x = adaptive_avg_pool_cmajor(x, 2, 1)          # (C_last, B*T, 2, 1)
    feat = flatten_nchw(x)                         # (B*T, n_units)

    # ----- reshape: (B, T, n_units).unsqueeze(1) -> NCHW (B, 1, T, n_units)
    # channel-major layout: (1, B, T, n_units)
    n_units = feat.shape[1]
    x = feat.reshape(1, B, T, n_units)

    # ----- cnn_ts stage
    for layer in params['cnn_ts']:
        if isinstance(layer, str):                 # 'M'
            x = maxpool_cmajor(x, 2, 3)
        else:
            x = conv3x3_bn_relu(x, layer)
    x = adaptive_avg_pool_cmajor(x, 1, 4)          # (C_ts_last, B, 1, 4)
    feat_ts = flatten_nchw(x)                      # (B, n_units_ts)

    # ----- head
    return mlp_head(feat_ts, params['head'])       # (B, num_classes)


if __name__ == "__main__":
    key = jax.random.PRNGKey(0)
    kx, kp = jax.random.split(key)

    cfg = [4, 'M', 8]        # cnn:    conv(4) -> maxpool(2,2) -> conv(8)
    cfg_ts = [4, 'M', 8]     # cnn_ts: conv(4) -> maxpool(2,3) -> conv(8)
    n_units_ts = 4 * 8       # AdaptiveAvgPool2d((1,4)) -> 4 * last ts-channels
    num_classes = 100

    # x: (batch=2, timesteps=4, C=1, H=16, W=16)
    x = jax.random.normal(kx, (2, 4, 1, 16, 16), jnp.float32)
    params = init_params(kp, cfg, cfg_ts, n_units_ts, num_classes=num_classes)

    fwd = jax.jit(lambda inp: cnn_cnn_forward(params, inp))
    out = fwd(x)
    out = jax.block_until_ready(out)
    assert out.shape == (2, num_classes), out.shape
    assert bool(jnp.all(jnp.isfinite(out)))
    print("KERNEL_OK")
</pallas_src>

<mosaic_0001>
module attributes {stable_mosaic.version = 11 : i64} {
  func.func @conv_bn_relu_kernel(%arg0: i32, %arg1: memref<9x2048xf32, #tpu.memory_space<vmem>>, %arg2: memref<4x9xbf16, #tpu.memory_space<vmem>>, %arg3: memref<4x1xf32, #tpu.memory_space<vmem>>, %arg4: memref<4x1xf32, #tpu.memory_space<vmem>>, %arg5: memref<4x2048xf32, #tpu.memory_space<vmem>>) attributes {dimension_semantics = [#tpu.dimension_semantics<arbitrary>], iteration_bounds = array<i64: 1>, scalar_prefetch = 0 : i64, scratch_operands = 0 : i64, tpu.core_type = #tpu.core_type<tc>, window_params = [{pipeline_mode = #tpu.pipeline_mode<synchronous>, transform_indices = @transform_0, window_bounds = array<i64: 9, 2048>}, {pipeline_mode = #tpu.pipeline_mode<synchronous>, transform_indices = @transform_1, window_bounds = array<i64: 4, 9>}, {pipeline_mode = #tpu.pipeline_mode<synchronous>, transform_indices = @transform_2, window_bounds = array<i64: 4, 1>}, {pipeline_mode = #tpu.pipeline_mode<synchronous>, transform_indices = @transform_3, window_bounds = array<i64: 4, 1>}, {pipeline_mode = #tpu.pipeline_mode<synchronous>, transform_indices = @transform_4, window_bounds = array<i64: 4, 2048>}]} {
    %c0 = arith.constant 0 : index
    %c0_0 = arith.constant 0 : index
    %0 = vector.load %arg2[%c0, %c0_0] : memref<4x9xbf16, #tpu.memory_space<vmem>>, vector<4x9xbf16>
    %c0_1 = arith.constant 0 : index
    %c0_2 = arith.constant 0 : index
    %1 = vector.load %arg1[%c0_1, %c0_2] : memref<9x2048xf32, #tpu.memory_space<vmem>>, vector<9x2048xf32>
    %2 = arith.truncf %1 : vector<9x2048xf32> to vector<9x2048xbf16>
    %cst = arith.constant dense<0.000000e+00> : vector<4x2048xf32>
    %3 = tpu.matmul %0, %2, %cst {dimension_numbers = #tpu.dot_dimension_numbers<[1], [0], [0], [1], [0, 0, 1, 1], [], []>} : vector<4x9xbf16>, vector<9x2048xbf16>, vector<4x2048xf32> -> vector<4x2048xf32>
    %c0_3 = arith.constant 0 : index
    %c0_4 = arith.constant 0 : index
    %4 = vector.load %arg3[%c0_3, %c0_4] : memref<4x1xf32, #tpu.memory_space<vmem>>, vector<4x1xf32>
    %5 = vector.broadcast %4 : vector<4x1xf32> to vector<4x2048xf32>
    %6 = arith.mulf %3, %5 : vector<4x2048xf32>
    %c0_5 = arith.constant 0 : index
    %c0_6 = arith.constant 0 : index
    %7 = vector.load %arg4[%c0_5, %c0_6] : memref<4x1xf32, #tpu.memory_space<vmem>>, vector<4x1xf32>
    %8 = vector.broadcast %7 : vector<4x1xf32> to vector<4x2048xf32>
    %9 = arith.addf %6, %8 : vector<4x2048xf32>
    %cst_7 = arith.constant 0.000000e+00 : f32
    %10 = vector.broadcast %cst_7 : f32 to vector<4x2048xf32>
    %11 = arith.maximumf %9, %10 : vector<4x2048xf32>
    %c0_8 = arith.constant 0 : index
    %c0_9 = arith.constant 0 : index
    %12 = vector.load %arg5[%c0_8, %c0_9] : memref<4x2048xf32, #tpu.memory_space<vmem>>, vector<4x2048xf32>
    tpu.vector_store %arg5[%c0_8, %c0_9], %11 {strides = array<i32>} : memref<4x2048xf32, #tpu.memory_space<vmem>>, vector<4x2048xf32>,
    return
  }
  func.func @transform_0(%arg0: i32) -> (i32, i32) {
    %c0_i32 = arith.constant 0 : i32
    %c0_i32_0 = arith.constant 0 : i32
    %c0_i32_1 = arith.constant 0 : i32
    return %c0_i32, %c0_i32_0 : i32, i32
  }
  func.func @transform_1(%arg0: i32) -> (i32, i32) {
    %c0_i32 = arith.constant 0 : i32
    %c0_i32_0 = arith.constant 0 : i32
    %c0_i32_1 = arith.constant 0 : i32
    return %c0_i32, %c0_i32_0 : i32, i32
  }
  func.func @transform_2(%arg0: i32) -> (i32, i32) {
    %c0_i32 = arith.constant 0 : i32
    %c0_i32_0 = arith.constant 0 : i32
    %c0_i32_1 = arith.constant 0 : i32
    return %c0_i32, %c0_i32_0 : i32, i32
  }
  func.func @transform_3(%arg0: i32) -> (i32, i32) {
    %c0_i32 = arith.constant 0 : i32
    %c0_i32_0 = arith.constant 0 : i32
    %c0_i32_1 = arith.constant 0 : i32
    return %c0_i32, %c0_i32_0 : i32, i32
  }
  func.func @transform_4(%arg0: i32) -> (i32, i32) {
    %c0_i32 = arith.constant 0 : i32
    %c0_i32_0 = arith.constant 0 : i32
    %c0_i32_1 = arith.constant 0 : i32
    return %c0_i32, %c0_i32_0 : i32, i32
  }
}

module attributes {stable_mosaic.version = 11 : i64} {
  func.func @conv_bn_relu_kernel(%arg0: i32, %arg1: memref<36x512xf32, #tpu.memory_space<vmem>>, %arg2: memref<8x36xbf16, #tpu.memory_space<vmem>>, %arg3: memref<8x1xf32, #tpu.memory_space<vmem>>, %arg4: memref<8x1xf32, #tpu.memory_space<vmem>>, %arg5: memref<8x512xf32, #tpu.memory_space<vmem>>) attributes {dimension_semantics = [#tpu.dimension_semantics<arbitrary>], iteration_bounds = array<i64: 1>, scalar_prefetch = 0 : i64, scratch_operands = 0 : i64, tpu.core_type = #tpu.core_type<tc>, window_params = [{pipeline_mode = #tpu.pipeline_mode<synchronous>, transform_indices = @transform_0, window_bounds = array<i64: 36, 512>}, {pipeline_mode = #tpu.pipeline_mode<synchronous>, transform_indices = @transform_1, window_bounds = array<i64: 8, 36>}, {pipeline_mode = #tpu.pipeline_mode<synchronous>, transform_indices = @transform_2, window_bounds = array<i64: 8, 1>}, {pipeline_mode = #tpu.pipeline_mode<synchronous>, transform_indices = @transform_3, window_bounds = array<i64: 8, 1>}, {pipeline_mode = #tpu.pipeline_mode<synchronous>, transform_indices = @transform_4, window_bounds = array<i64: 8, 512>}]} {
    %c0 = arith.constant 0 : index
    %c0_0 = arith.constant 0 : index
    %0 = vector.load %arg2[%c0, %c0_0] : memref<8x36xbf16, #tpu.memory_space<vmem>>, vector<8x36xbf16>
    %c0_1 = arith.constant 0 : index
    %c0_2 = arith.constant 0 : index
    %1 = vector.load %arg1[%c0_1, %c0_2] : memref<36x512xf32, #tpu.memory_space<vmem>>, vector<36x512xf32>
    %2 = arith.truncf %1 : vector<36x512xf32> to vector<36x512xbf16>
    %cst = arith.constant dense<0.000000e+00> : vector<8x512xf32>
    %3 = tpu.matmul %0, %2, %cst {dimension_numbers = #tpu.dot_dimension_numbers<[1], [0], [0], [1], [0, 0, 1, 1], [], []>} : vector<8x36xbf16>, vector<36x512xbf16>, vector<8x512xf32> -> vector<8x512xf32>
    %c0_3 = arith.constant 0 : index
    %c0_4 = arith.constant 0 : index
    %4 = vector.load %arg3[%c0_3, %c0_4] : memref<8x1xf32, #tpu.memory_space<vmem>>, vector<8x1xf32>
    %5 = vector.broadcast %4 : vector<8x1xf32> to vector<8x512xf32>
    %6 = arith.mulf %3, %5 : vector<8x512xf32>
    %c0_5 = arith.constant 0 : index
    %c0_6 = arith.constant 0 : index
    %7 = vector.load %arg4[%c0_5, %c0_6] : memref<8x1xf32, #tpu.memory_space<vmem>>, vector<8x1xf32>
    %8 = vector.broadcast %7 : vector<8x1xf32> to vector<8x512xf32>
    %9 = arith.addf %6, %8 : vector<8x512xf32>
    %cst_7 = arith.constant 0.000000e+00 : f32
    %10 = vector.broadcast %cst_7 : f32 to vector<8x512xf32>
    %11 = arith.maximumf %9, %10 : vector<8x512xf32>
    %c0_8 = arith.constant 0 : index
    %c0_9 = arith.constant 0 : index
    %12 = vector.load %arg5[%c0_8, %c0_9] : memref<8x512xf32, #tpu.memory_space<vmem>>, vector<8x512xf32>
    tpu.vector_store %arg5[%c0_8, %c0_9], %11 {strides = array<i32>} : memref<8x512xf32, #tpu.memory_space<vmem>>, vector<8x512xf32>,
    return
  }
  func.func @transform_0(%arg0: i32) -> (i32, i32) {
    %c0_i32 = arith.constant 0 : i32
    %c0_i32_0 = arith.constant 0 : i32
    %c0_i32_1 = arith.constant 0 : i32
    return %c0_i32, %c0_i32_0 : i32, i32
  }
  func.func @transform_1(%arg0: i32) -> (i32, i32) {
    %c0_i32 = arith.constant 0 : i32
    %c0_i32_0 = arith.constant 0 : i32
    %c0_i32_1 = arith.constant 0 : i32
    return %c0_i32, %c0_i32_0 : i32, i32
  }
  func.func @transform_2(%arg0: i32) -> (i32, i32) {
    %c0_i32 = arith.constant 0 : i32
    %c0_i32_0 = arith.constant 0 : i32
    %c0_i32_1 = arith.constant 0 : i32
    return %c0_i32, %c0_i32_0 : i32, i32
  }
  func.func @transform_3(%arg0: i32) -> (i32, i32) {
    %c0_i32 = arith.constant 0 : i32
    %c0_i32_0 = arith.constant 0 : i32
    %c0_i32_1 = arith.constant 0 : i32
    return %c0_i32, %c0_i32_0 : i32, i32
  }
  func.func @transform_4(%arg0: i32) -> (i32, i32) {
    %c0_i32 = arith.constant 0 : i32
    %c0_i32_0 = arith.constant 0 : i32
    %c0_i32_1 = arith.constant 0 : i32
    return %c0_i32, %c0_i32_0 : i32, i32
  }
}

module attributes {stable_mosaic.version = 11 : i64} {
  func.func @conv_bn_relu_kernel(%arg0: i32, %arg1: memref<9x128xf32, #tpu.memory_space<vmem>>, %arg2: memref<4x9xbf16, #tpu.memory_space<vmem>>, %arg3: memref<4x1xf32, #tpu.memory_space<vmem>>, %arg4: memref<4x1xf32, #tpu.memory_space<vmem>>, %arg5: memref<4x128xf32, #tpu.memory_space<vmem>>) attributes {dimension_semantics = [#tpu.dimension_semantics<arbitrary>], iteration_bounds = array<i64: 1>, scalar_prefetch = 0 : i64, scratch_operands = 0 : i64, tpu.core_type = #tpu.core_type<tc>, window_params = [{pipeline_mode = #tpu.pipeline_mode<synchronous>, transform_indices = @transform_0, window_bounds = array<i64: 9, 128>}, {pipeline_mode = #tpu.pipeline_mode<synchronous>, transform_indices = @transform_1, window_bounds = array<i64: 4, 9>}, {pipeline_mode = #tpu.pipeline_mode<synchronous>, transform_indices = @transform_2, window_bounds = array<i64: 4, 1>}, {pipeline_mode = #tpu.pipeline_mode<synchronous>, transform_indices = @transform_3, window_bounds = array<i64: 4, 1>}, {pipeline_mode = #tpu.pipeline_mode<synchronous>, transform_indices = @transform_4, window_bounds = array<i64: 4, 128>}]} {
    %c0 = arith.constant 0 : index
    %c0_0 = arith.constant 0 : index
    %0 = vector.load %arg2[%c0, %c0_0] : memref<4x9xbf16, #tpu.memory_space<vmem>>, vector<4x9xbf16>
    %c0_1 = arith.constant 0 : index
    %c0_2 = arith.constant 0 : index
    %1 = vector.load %arg1[%c0_1, %c0_2] : memref<9x128xf32, #tpu.memory_space<vmem>>, vector<9x128xf32>
    %2 = arith.truncf %1 : vector<9x128xf32> to vector<9x128xbf16>
    %cst = arith.constant dense<0.000000e+00> : vector<4x128xf32>
    %3 = tpu.matmul %0, %2, %cst {dimension_numbers = #tpu.dot_dimension_numbers<[1], [0], [0], [1], [0, 0, 1, 1], [], []>} : vector<4x9xbf16>, vector<9x128xbf16>, vector<4x128xf32> -> vector<4x128xf32>
    %c0_3 = arith.constant 0 : index
    %c0_4 = arith.constant 0 : index
    %4 = vector.load %arg3[%c0_3, %c0_4] : memref<4x1xf32, #tpu.memory_space<vmem>>, vector<4x1xf32>
    %5 = vector.broadcast %4 : vector<4x1xf32> to vector<4x128xf32>
    %6 = arith.mulf %3, %5 : vector<4x128xf32>
    %c0_5 = arith.constant 0 : index
    %c0_6 = arith.constant 0 : index
    %7 = vector.load %arg4[%c0_5, %c0_6] : memref<4x1xf32, #tpu.memory_space<vmem>>, vector<4x1xf32>
    %8 = vector.broadcast %7 : vector<4x1xf32> to vector<4x128xf32>
    %9 = arith.addf %6, %8 : vector<4x128xf32>
    %cst_7 = arith.constant 0.000000e+00 : f32
    %10 = vector.broadcast %cst_7 : f32 to vector<4x128xf32>
    %11 = arith.maximumf %9, %10 : vector<4x128xf32>
    %c0_8 = arith.constant 0 : index
    %c0_9 = arith.constant 0 : index
    %12 = vector.load %arg5[%c0_8, %c0_9] : memref<4x128xf32, #tpu.memory_space<vmem>>, vector<4x128xf32>
    tpu.vector_store %arg5[%c0_8, %c0_9], %11 {strides = array<i32>} : memref<4x128xf32, #tpu.memory_space<vmem>>, vector<4x128xf32>,
    return
  }
  func.func @transform_0(%arg0: i32) -> (i32, i32) {
    %c0_i32 = arith.constant 0 : i32
    %c0_i32_0 = arith.constant 0 : i32
    %c0_i32_1 = arith.constant 0 : i32
    return %c0_i32, %c0_i32_0 : i32, i32
  }
  func.func @transform_1(%arg0: i32) -> (i32, i32) {
    %c0_i32 = arith.constant 0 : i32
    %c0_i32_0 = arith.constant 0 : i32
    %c0_i32_1 = arith.constant 0 : i32
    return %c0_i32, %c0_i32_0 : i32, i32
  }
  func.func @transform_2(%arg0: i32) -> (i32, i32) {
    %c0_i32 = arith.constant 0 : i32
    %c0_i32_0 = arith.constant 0 : i32
    %c0_i32_1 = arith.constant 0 : i32
    return %c0_i32, %c0_i32_0 : i32, i32
  }
  func.func @transform_3(%arg0: i32) -> (i32, i32) {
    %c0_i32 = arith.constant 0 : i32
    %c0_i32_0 = arith.constant 0 : i32
    %c0_i32_1 = arith.constant 0 : i32
    return %c0_i32, %c0_i32_0 : i32, i32
  }
  func.func @transform_4(%arg0: i32) -> (i32, i32) {
    %c0_i32 = arith.constant 0 : i32
    %c0_i32_0 = arith.constant 0 : i32
    %c0_i32_1 = arith.constant 0 : i32
    return %c0_i32, %c0_i32_0 : i32, i32
  }
}

module attributes {stable_mosaic.version = 11 : i64} {
  func.func @conv_bn_relu_kernel(%arg0: i32, %arg1: memref<36x20xf32, #tpu.memory_space<vmem>>, %arg2: memref<8x36xbf16, #tpu.memory_space<vmem>>, %arg3: memref<8x1xf32, #tpu.memory_space<vmem>>, %arg4: memref<8x1xf32, #tpu.memory_space<vmem>>, %arg5: memref<8x20xf32, #tpu.memory_space<vmem>>) attributes {dimension_semantics = [#tpu.dimension_semantics<arbitrary>], iteration_bounds = array<i64: 1>, scalar_prefetch = 0 : i64, scratch_operands = 0 : i64, tpu.core_type = #tpu.core_type<tc>, window_params = [{pipeline_mode = #tpu.pipeline_mode<synchronous>, transform_indices = @transform_0, window_bounds = array<i64: 36, 20>}, {pipeline_mode = #tpu.pipeline_mode<synchronous>, transform_indices = @transform_1, window_bounds = array<i64: 8, 36>}, {pipeline_mode = #tpu.pipeline_mode<synchronous>, transform_indices = @transform_2, window_bounds = array<i64: 8, 1>}, {pipeline_mode = #tpu.pipeline_mode<synchronous>, transform_indices = @transform_3, window_bounds = array<i64: 8, 1>}, {pipeline_mode = #tpu.pipeline_mode<synchronous>, transform_indices = @transform_4, window_bounds = array<i64: 8, 20>}]} {
    %c0 = arith.constant 0 : index
    %c0_0 = arith.constant 0 : index
    %0 = vector.load %arg2[%c0, %c0_0] : memref<8x36xbf16, #tpu.memory_space<vmem>>, vector<8x36xbf16>
    %c0_1 = arith.constant 0 : index
    %c0_2 = arith.constant 0 : index
    %1 = vector.load %arg1[%c0_1, %c0_2] : memref<36x20xf32, #tpu.memory_space<vmem>>, vector<36x20xf32>
    %2 = arith.truncf %1 : vector<36x20xf32> to vector<36x20xbf16>
    %cst = arith.constant dense<0.000000e+00> : vector<8x20xf32>
    %3 = tpu.matmul %0, %2, %cst {dimension_numbers = #tpu.dot_dimension_numbers<[1], [0], [0], [1], [0, 0, 1, 1], [], []>} : vector<8x36xbf16>, vector<36x20xbf16>, vector<8x20xf32> -> vector<8x20xf32>
    %c0_3 = arith.constant 0 : index
    %c0_4 = arith.constant 0 : index
    %4 = vector.load %arg3[%c0_3, %c0_4] : memref<8x1xf32, #tpu.memory_space<vmem>>, vector<8x1xf32>
    %5 = vector.broadcast %4 : vector<8x1xf32> to vector<8x20xf32>
    %6 = arith.mulf %3, %5 : vector<8x20xf32>
    %c0_5 = arith.constant 0 : index
    %c0_6 = arith.constant 0 : index
    %7 = vector.load %arg4[%c0_5, %c0_6] : memref<8x1xf32, #tpu.memory_space<vmem>>, vector<8x1xf32>
    %8 = vector.broadcast %7 : vector<8x1xf32> to vector<8x20xf32>
    %9 = arith.addf %6, %8 : vector<8x20xf32>
    %cst_7 = arith.constant 0.000000e+00 : f32
    %10 = vector.broadcast %cst_7 : f32 to vector<8x20xf32>
    %11 = arith.maximumf %9, %10 : vector<8x20xf32>
    %c0_8 = arith.constant 0 : index
    %c0_9 = arith.constant 0 : index
    %12 = vector.load %arg5[%c0_8, %c0_9] : memref<8x20xf32, #tpu.memory_space<vmem>>, vector<8x20xf32>
    tpu.vector_store %arg5[%c0_8, %c0_9], %11 {strides = array<i32>} : memref<8x20xf32, #tpu.memory_space<vmem>>, vector<8x20xf32>,
    return
  }
  func.func @transform_0(%arg0: i32) -> (i32, i32) {
    %c0_i32 = arith.constant 0 : i32
    %c0_i32_0 = arith.constant 0 : i32
    %c0_i32_1 = arith.constant 0 : i32
    return %c0_i32, %c0_i32_0 : i32, i32
  }
  func.func @transform_1(%arg0: i32) -> (i32, i32) {
    %c0_i32 = arith.constant 0 : i32
    %c0_i32_0 = arith.constant 0 : i32
    %c0_i32_1 = arith.constant 0 : i32
    return %c0_i32, %c0_i32_0 : i32, i32
  }
  func.func @transform_2(%arg0: i32) -> (i32, i32) {
    %c0_i32 = arith.constant 0 : i32
    %c0_i32_0 = arith.constant 0 : i32
    %c0_i32_1 = arith.constant 0 : i32
    return %c0_i32, %c0_i32_0 : i32, i32
  }
  func.func @transform_3(%arg0: i32) -> (i32, i32) {
    %c0_i32 = arith.constant 0 : i32
    %c0_i32_0 = arith.constant 0 : i32
    %c0_i32_1 = arith.constant 0 : i32
    return %c0_i32, %c0_i32_0 : i32, i32
  }
  func.func @transform_4(%arg0: i32) -> (i32, i32) {
    %c0_i32 = arith.constant 0 : i32
    %c0_i32_0 = arith.constant 0 : i32
    %c0_i32_1 = arith.constant 0 : i32
    return %c0_i32, %c0_i32_0 : i32, i32
  }
}

module attributes {stable_mosaic.version = 11 : i64} {
  func.func @head_kernel(%arg0: i32, %arg1: memref<2x32xf32, #tpu.memory_space<vmem>>, %arg2: memref<32x512xbf16, #tpu.memory_space<vmem>>, %arg3: memref<1x512xf32, #tpu.memory_space<vmem>>, %arg4: memref<512x100xbf16, #tpu.memory_space<vmem>>, %arg5: memref<1x100xf32, #tpu.memory_space<vmem>>, %arg6: memref<2x100xf32, #tpu.memory_space<vmem>>) attributes {dimension_semantics = [#tpu.dimension_semantics<arbitrary>], iteration_bounds = array<i64: 1>, scalar_prefetch = 0 : i64, scratch_operands = 0 : i64, tpu.core_type = #tpu.core_type<tc>, window_params = [{pipeline_mode = #tpu.pipeline_mode<synchronous>, transform_indices = @transform_0, window_bounds = array<i64: 2, 32>}, {pipeline_mode = #tpu.pipeline_mode<synchronous>, transform_indices = @transform_1, window_bounds = array<i64: 32, 512>}, {pipeline_mode = #tpu.pipeline_mode<synchronous>, transform_indices = @transform_2, window_bounds = array<i64: 1, 512>}, {pipeline_mode = #tpu.pipeline_mode<synchronous>, transform_indices = @transform_3, window_bounds = array<i64: 512, 100>}, {pipeline_mode = #tpu.pipeline_mode<synchronous>, transform_indices = @transform_4, window_bounds = array<i64: 1, 100>}, {pipeline_mode = #tpu.pipeline_mode<synchronous>, transform_indices = @transform_5, window_bounds = array<i64: 2, 100>}]} {
    %c0 = arith.constant 0 : index
    %c0_0 = arith.constant 0 : index
    %0 = vector.load %arg1[%c0, %c0_0] : memref<2x32xf32, #tpu.memory_space<vmem>>, vector<2x32xf32>
    %1 = arith.truncf %0 : vector<2x32xf32> to vector<2x32xbf16>
    %c0_1 = arith.constant 0 : index
    %c0_2 = arith.constant 0 : index
    %2 = vector.load %arg2[%c0_1, %c0_2] : memref<32x512xbf16, #tpu.memory_space<vmem>>, vector<32x512xbf16>
    %cst = arith.constant dense<0.000000e+00> : vector<2x512xf32>
    %3 = tpu.matmul %1, %2, %cst {dimension_numbers = #tpu.dot_dimension_numbers<[1], [0], [0], [1], [0, 0, 1, 1], [], []>} : vector<2x32xbf16>, vector<32x512xbf16>, vector<2x512xf32> -> vector<2x512xf32>
    %c0_3 = arith.constant 0 : index
    %c0_4 = arith.constant 0 : index
    %4 = vector.load %arg3[%c0_3, %c0_4] : memref<1x512xf32, #tpu.memory_space<vmem>>, vector<1x512xf32>
    %5 = vector.broadcast %4 : vector<1x512xf32> to vector<2x512xf32>
    %6 = arith.addf %3, %5 : vector<2x512xf32>
    %cst_5 = arith.constant 0.000000e+00 : f32
    %7 = vector.broadcast %cst_5 : f32 to vector<2x512xf32>
    %8 = arith.maximumf %6, %7 : vector<2x512xf32>
    %9 = arith.truncf %8 : vector<2x512xf32> to vector<2x512xbf16>
    %c0_6 = arith.constant 0 : index
    %c0_7 = arith.constant 0 : index
    %10 = vector.load %arg4[%c0_6, %c0_7] : memref<512x100xbf16, #tpu.memory_space<vmem>>, vector<512x100xbf16>
    %cst_8 = arith.constant dense<0.000000e+00> : vector<2x100xf32>
    %11 = tpu.matmul %9, %10, %cst_8 {dimension_numbers = #tpu.dot_dimension_numbers<[1], [0], [0], [1], [0, 0, 1, 1], [], []>} : vector<2x512xbf16>, vector<512x100xbf16>, vector<2x100xf32> -> vector<2x100xf32>
    %c0_9 = arith.constant 0 : index
    %c0_10 = arith.constant 0 : index
    %12 = vector.load %arg5[%c0_9, %c0_10] : memref<1x100xf32, #tpu.memory_space<vmem>>, vector<1x100xf32>
    %13 = vector.broadcast %12 : vector<1x100xf32> to vector<2x100xf32>
    %14 = arith.addf %11, %13 : vector<2x100xf32>
    %c0_11 = arith.constant 0 : index
    %c0_12 = arith.constant 0 : index
    %15 = vector.load %arg6[%c0_11, %c0_12] : memref<2x100xf32, #tpu.memory_space<vmem>>, vector<2x100xf32>
    tpu.vector_store %arg6[%c0_11, %c0_12], %14 {strides = array<i32>} : memref<2x100xf32, #tpu.memory_space<vmem>>, vector<2x100xf32>,
    return
  }
  func.func @transform_0(%arg0: i32) -> (i32, i32) {
    %c0_i32 = arith.constant 0 : i32
    %c0_i32_0 = arith.constant 0 : i32
    %c0_i32_1 = arith.constant 0 : i32
    return %c0_i32, %c0_i32_0 : i32, i32
  }
  func.func @transform_1(%arg0: i32) -> (i32, i32) {
    %c0_i32 = arith.constant 0 : i32
    %c0_i32_0 = arith.constant 0 : i32
    %c0_i32_1 = arith.constant 0 : i32
    return %c0_i32, %c0_i32_0 : i32, i32
  }
  func.func @transform_2(%arg0: i32) -> (i32, i32) {
    %c0_i32 = arith.constant 0 : i32
    %c0_i32_0 = arith.constant 0 : i32
    %c0_i32_1 = arith.constant 0 : i32
    return %c0_i32, %c0_i32_0 : i32, i32
  }
  func.func @transform_3(%arg0: i32) -> (i32, i32) {
    %c0_i32 = arith.constant 0 : i32
    %c0_i32_0 = arith.constant 0 : i32
    %c0_i32_1 = arith.constant 0 : i32
    return %c0_i32, %c0_i32_0 : i32, i32
  }
  func.func @transform_4(%arg0: i32) -> (i32, i32) {
    %c0_i32 = arith.constant 0 : i32
    %c0_i32_0 = arith.constant 0 : i32
    %c0_i32_1 = arith.constant 0 : i32
    return %c0_i32, %c0_i32_0 : i32, i32
  }
  func.func @transform_5(%arg0: i32) -> (i32, i32) {
    %c0_i32 = arith.constant 0 : i32
    %c0_i32_0 = arith.constant 0 : i32
    %c0_i32_1 = arith.constant 0 : i32
    return %c0_i32, %c0_i32_0 : i32, i32
  }
}

</mosaic_0001>

<bundles_post_ra>
// kernel: _lambda_.5
= control target key start
LH: loop header
LB: loop body
LE: loop exit
PB: predicated region body
PF: predicated region fallthrough
CT: control target
= control target key end

     0   :  { %9 = vsyncpa [#allocation3], 0  ;;  %s604_s15 = smov [#allocation2]   ;;  %s851_s0 = inlined_call_operand.vmem [shape: f32[9,2048], index: 0, kind: input, shape index: {}]   ;;  %s852_s1 = inlined_call_operand.hbm [shape: bf16[4,9], index: 1, kind: input, shape index: {}]   ;;  %s853_s2 = inlined_call_operand.vmem [shape: f32[4,1], index: 2, kind: input, shape index: {}]   ;;  %s854_s3 = inlined_call_operand.vmem [shape: f32[4,1], index: 3, kind: input, shape index: {}]   ;;  %s855_s4 = inlined_call_operand.vmem [shape: f32[4,2048], index: 4, kind: output, shape index: {}]  }
   0x1   :  { %s18_s16 = sshll.u32 %s604_s15, 4  ;;  %s580_s19 = scalar_lea.hbm %s852_s1, 32  ;;  %s19_s16 = int_to_ptr.vmem [resolvable:$true] %s18_s16 }
   0x2   :  { %p581_p0 = scmp.ne.s32.totalorder %s852_s1, %s580_s19  ;;  %p584_p1 = scmp.lt.u32.totalorder %s580_s19, %s852_s1 }
   0x4   :  { %p586_p2 = pnand %p584_p1, %p581_p0 }
   0x6   :  { %589 = shalt.err (!%p586_p2)
}
   0x7   :  { %s590_s24 = scalar_lea.vmem %s19_s16, 32  ;;  %p595_p4 = scmp.lt.s32.totalorder %s19_s16, %s19_s16 }
   0x8   :  { %p591_p3 = scmp.ne.s32.totalorder %s19_s16, %s590_s24  ;;  %p596_p5 = scmp.lt.s32.totalorder %s590_s24, %s590_s24 }
   0xa   :  { %p597_p6 = por %p596_p5, %p595_p4 }
   0xc   :  { %p598_p7 = pnand %p597_p6, %p591_p3 }
   0xe   :  { %601 = shalt.err (!%p598_p7)
}
   0xf   :  { %21 = dma.hbm_to_vmem [thread:$0]  %s852_s1, 32, %s19_s16, [#allocation3]  }
  0x10   :  { %602 = dma.done.wait [#allocation3], 32  }
  0x11   :  { %603 = vsyncadd [#allocation3], 4294967264  ;;  %vm83_vm0 = vcmask 1043456   ;;  %v605_v0 = vmov 0   ;;  %vm84_vm1 = vcmask 1044480   ;;  %v606_v1 = vmov 65535  }
  0x12   :  { %167 = vmatprep.mubr.bf16.mxu0 %v605_v0  ;;  %208 = vmatprep.mubr.bf16.mxu1 %v605_v0  ;;  %v85_v2 = vsel %vm83_vm0, 4294967295, %v606_v1  ;;  %v32_v3 = vld [vmem:[%s851_s0 + $0x8] sm:$0xff]  ;;  %v34_v6 = vld [vmem:[%s851_s0 + $0x18] sm:$0xff]  ;;  %v31_v9 = vld [vmem:[%s851_s0] sm:$0xff]  ;;  %vm79_vm2 = vcmask 72704  }
  0x13   :  { %579 = vset.pattern.permute.xlu0 %v605_v0  ;;  %v48_v4 = vld [vmem:[%s851_s0 + $0x88] sm:$0x1]  ;;  %v653_v5 = vsel %vm84_vm1, %v85_v2, 0  ;;  %v50_v8 = vld [vmem:[%s851_s0 + $0x98] sm:$0x1]  ;;  %v33_v13 = vld [vmem:[%s851_s0 + $0x10] sm:$0xff] }
  0x14   :  { %v64_v7 = vpack.c.bf16 %v48_v4, %v32_v3  ;;  %v47_v10 = vld [vmem:[%s851_s0 + $0x80] sm:$0x1]  ;;  %v66_v11 = vpack.c.bf16 %v50_v8, %v34_v6  ;;  %v49_v14 = vld [vmem:[%s851_s0 + $0x90] sm:$0x1]  ;;  %v36_v17 = vld [vmem:[%s851_s0 + $0x28] sm:$0xff] }
  0x15   :  { %v63_v12 = vpack.c.bf16 %v47_v10, %v31_v9  ;;  %v65_v16 = vpack.c.bf16 %v49_v14, %v33_v13  ;;  %v52_v18 = vld [vmem:[%s851_s0 + $0xa8] sm:$0x1]  ;;  %v38_v19 = vld [vmem:[%s851_s0 + $0x38] sm:$0xff]  ;;  %v685_v22 = vld [vmem:[#allocation2] sm:$0x3] }
  0x16   :  { %v91_v15 = vand.u32 %v653_v5, %v64_v7  ;;  %v97_v20 = vand.u32 %v653_v5, %v66_v11  ;;  %v68_v23 = vpack.c.bf16 %v52_v18, %v36_v17  ;;  %v54_v24 = vld [vmem:[%s851_s0 + $0xb8] sm:$0x1]  ;;  %v35_v25 = vld [vmem:[%s851_s0 + $0x20] sm:$0xff]  ;;  %v37_v30 = vld [vmem:[%s851_s0 + $0x30] sm:$0xff] }
  0x17   :  { %v88_v21 = vand.u32 %v653_v5, %v63_v12  ;;  %v51_v26 = vld [vmem:[%s851_s0 + $0xa0] sm:$0x1]  ;;  %v94_v27 = vand.u32 %v653_v5, %v65_v16  ;;  %v70_v28 = vpack.c.bf16 %v54_v24, %v38_v19  ;;  %v53_v31 = vld [vmem:[%s851_s0 + $0xb0] sm:$0x1]  ;;  %v40_v32 = vld [vmem:[%s851_s0 + $0x48] sm:$0xff] }
  0x18   :  { %135 = vmatprep.subr.bf16.mxu0 %v91_v15  ;;  %v67_v29 = vpack.c.bf16 %v51_v26, %v35_v25  ;;  %176 = vmatprep.subr.bf16.mxu1 %v97_v20  ;;  %v103_v33 = vand.u32 %v653_v5, %v68_v23  ;;  %v69_v34 = vpack.c.bf16 %v53_v31, %v37_v30  ;;  %v56_v35 = vld [vmem:[%s851_s0 + $0xc8] sm:$0x1]  ;;  %v42_v36 = vld [vmem:[%s851_s0 + $0x58] sm:$0xff]  ;;  %v39_v42 = vld [vmem:[%s851_s0 + $0x40] sm:$0xff] }
  0x19   :  { %136 = vmatpush1.bf16.msra.mxu0 %v88_v21  ;;  %v58_v37 = vld [vmem:[%s851_s0 + $0xd8] sm:$0x1]  ;;  %177 = vmatpush1.bf16.msra.mxu1 %v94_v27  ;;  %v109_v38 = vand.u32 %v653_v5, %v70_v28  ;;  %v72_v40 = vpack.c.bf16 %v56_v35, %v40_v32  ;;  %v55_v43 = vld [vmem:[%s851_s0 + $0xc0] sm:$0x1]  ;;  %v41_v45 = vld [vmem:[%s851_s0 + $0x50] sm:$0xff] }
  0x1a   :  { %v100_v39 = vand.u32 %v653_v5, %v67_v29  ;;  %v74_v41 = vpack.c.bf16 %v58_v37, %v42_v36  ;;  %217 = vmatprep.subr.bf16.mxu0 %v103_v33  ;;  %v106_v44 = vand.u32 %v653_v5, %v69_v34  ;;  %v57_v46 = vld [vmem:[%s851_s0 + $0xd0] sm:$0x1]  ;;  %v44_v49 = vld [vmem:[%s851_s0 + $0x68] sm:$0xff]  ;;  %v71_v51 = vpack.c.bf16 %v55_v43, %v39_v42  ;;  %v46_v52 = vld [vmem:[%s851_s0 + $0x78] sm:$0xff] }
  0x1b   :  { %258 = vmatprep.subr.bf16.mxu1 %v109_v38  ;;  %v115_v47 = vand.u32 %v653_v5, %v72_v40  ;;  %v60_v50 = vld [vmem:[%s851_s0 + $0xe8] sm:$0x1]  ;;  %v62_v53 = vld [vmem:[%s851_s0 + $0xf8] sm:$0x1]  ;;  %v73_v54 = vpack.c.bf16 %v57_v46, %v41_v45  ;;  %v463_v55 = vld [vmem:[%s853_s2] sm:$0xf] }
  0x1c   :  { %568 = vmatmul.mubr.msk.bf16.vlgmr.msra.gmra.mrb[0].mxu0 %vm79_vm2, %v685_v22  ;;  %v121_v48 = vand.u32 %v653_v5, %v74_v41  ;;  %569 = vmatmul.mubr.msk.bf16.vlgmr.msra.gmra.mrb[0].mxu1 %vm79_vm2, %v685_v22  ;;  %v76_v56 = vpack.c.bf16 %v60_v50, %v44_v49  ;;  %v78_v57 = vpack.c.bf16 %v62_v53, %v46_v52  ;;  %v485_v59 = vld [vmem:[%s854_s3] sm:$0xf]  ;;  %v45_v1 = vld [vmem:[%s851_s0 + $0x70] sm:$0xff] }
  0x1d   :  { %218 = vmatpush1.bf16.msra.mxu0 %v100_v39  ;;  %259 = vmatpush1.bf16.msra.mxu1 %v106_v44  ;;  %v112_v58 = vand.u32 %v653_v5, %v71_v51  ;;  %v118_v60 = vand.u32 %v653_v5, %v73_v54  ;;  %v43_v61 = vld [vmem:[%s851_s0 + $0x60] sm:$0xff]  ;;  %v61_v2 = vld [vmem:[%s851_s0 + $0xf0] sm:$0x1] }
  0x1e   :  { %249 = vmatprep.mubr.bf16.mxu0 %v605_v0  ;;  %290 = vmatprep.mubr.bf16.mxu1 %v605_v0  ;;  %v59_v62 = vld [vmem:[%s851_s0 + $0xe0] sm:$0x1]  ;;  %v127_v63 = vand.u32 %v653_v5, %v76_v56  ;;  %v133_v3 = vand.u32 %v653_v5, %v78_v57  ;;  %v77_v6 = vpack.c.bf16 %v61_v2, %v45_v1 }
  0x1f   :  { %299 = vmatprep.subr.bf16.mxu0 %v115_v47  ;;  %340 = vmatprep.subr.bf16.mxu1 %v121_v48  ;;  %v75_v4 = vpack.c.bf16 %v59_v62, %v43_v61 }
  0x20   :  { %466 = vperm.xlu0 %579, %v463_v55   ;;  %v130_v8 = vand.u32 %v653_v5, %v77_v6 }
  0x21   :  { %v124_v7 = vand.u32 %v653_v5, %v75_v4 }
  0x24   :  { %570 = vmatmul.mubr.msk.bf16.vlgmr.msra.gmra.mrb[4].mxu0 %vm79_vm2, %v685_v22  ;;  %488 = vperm.xlu0 %579, %v485_v59  }
  0x25   :  { %571 = vmatmul.mubr.msk.bf16.vlgmr.msra.gmra.mrb[4].mxu1 %vm79_vm2, %v685_v22  ;;  %300 = vmatpush1.bf16.msra.mxu0 %v112_v58 }
  0x26   :  { %341 = vmatpush1.bf16.msra.mxu1 %v118_v60  ;;  %331 = vmatprep.mubr.bf16.mxu0 %v605_v0 }
  0x27   :  { %372 = vmatprep.mubr.bf16.mxu1 %v605_v0  ;;  %381 = vmatprep.subr.bf16.mxu0 %v127_v63 }
  0x28   :  { %422 = vmatprep.subr.bf16.mxu1 %v133_v3 }
  0x2c   :  { %572 = vmatmul.mubr.msk.bf16.vlgmr.msra.gmra.mrb[8].mxu0 %vm79_vm2, %v685_v22 }
  0x2d   :  { %573 = vmatmul.mubr.msk.bf16.vlgmr.msra.gmra.mrb[8].mxu1 %vm79_vm2, %v685_v22  ;;  %382 = vmatpush1.bf16.msra.mxu0 %v124_v7 }
  0x2e   :  { %423 = vmatpush1.bf16.msra.mxu1 %v130_v8  ;;  %413 = vmatprep.mubr.bf16.mxu0 %v605_v0 }
  0x2f   :  { %454 = vmatprep.mubr.bf16.mxu1 %v605_v0 }
  0x34   :  { %574 = vmatmul.mubr.msk.bf16.vlgmr.msra.gmra.mrb[12].mxu0 %vm79_vm2, %v685_v22 }
  0x35   :  { %575 = vmatmul.mubr.msk.bf16.vlgmr.msra.gmra.mrb[12].mxu1 %vm79_vm2, %v685_v22 }
  0x9f   :  { %v791_v9 = vpop.permute.xlu0 %466 }
  0xa3   :  { %v793_v10 = vpop.permute.xlu0 %488 }
  0xef   :  { %v169_v5 = vpop.f32.mrb[0].mxu0  ;;  %v210_v12 = vpop.f32.mrb[0].mxu1 }
  0xf0   :  { %v469_v11 = vmul.f32 %v791_v9, %v169_v5  ;;  %v171_v13 = vpop.f32.mrb[1].mxu0  ;;  %v471_v14 = vmul.f32 %v791_v9, %v210_v12  ;;  %v212_v0 = vpop.f32.mrb[1].mxu1 }
  0xf1   :  { %v470_v15 = vmul.f32 %v791_v9, %v171_v13  ;;  %v173_v16 = vpop.f32.mrb[2].mxu0  ;;  %v472_v17 = vmul.f32 %v791_v9, %v212_v0  ;;  %v214_v18 = vpop.f32.mrb[2].mxu1 }
  0xf2   :  { %v491_v19 = vadd.f32 %v793_v10, %v469_v11  ;;  %v174_v20 = vpop.f32.mrb[3].mxu0  ;;  %v493_v22 = vadd.f32 %v793_v10, %v471_v14  ;;  %v215_v23 = vpop.f32.mrb[3].mxu1 }
  0xf3   :  { %v492_v21 = vadd.f32 %v793_v10, %v470_v15  ;;  %v494_v24 = vadd.f32 %v793_v10, %v472_v17 }
  0xf4   :  { %v507_v25 = vmax.f32 %v491_v19, 0.0  ;;  %v509_v27 = vmax.f32 %v493_v22, 0.0 }
  0xf5   :  { %v508_v26 = vmax.f32 %v492_v21, 0.0  ;;  %v510_v28 = vmax.f32 %v494_v24, 0.0 }
  0xf7   :  { %v539_v29 = vcombine.low %v507_v25, %v508_v26  ;;  %v251_v30 = vpop.f32.mrb[4].mxu0  ;;  %v540_v31 = vcombine.low %v509_v27, %v510_v28 }
  0xf8   :  { %v473_v32 = vmul.f32 %v791_v9, %v251_v30  ;;  %v292_v33 = vpop.f32.mrb[4].mxu1  ;;  %v253_v34 = vpop.f32.mrb[5].mxu0 }
  0xf9   :  { %555 = vst [vmem:[%s855_s4] sm:$0xff] %v539_v29  ;;  %v475_v35 = vmul.f32 %v791_v9, %v292_v33  ;;  %v474_v36 = vmul.f32 %v791_v9, %v253_v34  ;;  %v294_v37 = vpop.f32.mrb[5].mxu1  ;;  %v255_v38 = vpop.f32.mrb[6].mxu0  ;;  %556 = vst [vmem:[%s855_s4 + $0x8] sm:$0xff] %v540_v31 }
  0xfa   :  { %v495_v39 = vadd.f32 %v793_v10, %v473_v32  ;;  %v476_v40 = vmul.f32 %v791_v9, %v294_v37  ;;  %v296_v41 = vpop.f32.mrb[6].mxu1  ;;  %v256_v42 = vpop.f32.mrb[7].mxu0 }
  0xfb   :  { %v497_v43 = vadd.f32 %v793_v10, %v475_v35  ;;  %v496_v44 = vadd.f32 %v793_v10, %v474_v36  ;;  %v297_v45 = vpop.f32.mrb[7].mxu1 }
  0xfc   :  { %v511_v46 = vmax.f32 %v495_v39, 0.0  ;;  %v498_v47 = vadd.f32 %v793_v10, %v476_v40 }
  0xfd   :  { %v513_v48 = vmax.f32 %v497_v43, 0.0  ;;  %v512_v49 = vmax.f32 %v496_v44, 0.0 }
  0xfe   :  { %v514_v50 = vmax.f32 %v498_v47, 0.0 }
  0xff   :  { %v541_v51 = vcombine.low %v511_v46, %v512_v49  ;;  %v333_v52 = vpop.f32.mrb[8].mxu0 }
 0x100   :  { %v542_v53 = vcombine.low %v513_v48, %v514_v50  ;;  %v477_v54 = vmul.f32 %v791_v9, %v333_v52  ;;  %v374_v55 = vpop.f32.mrb[8].mxu1  ;;  %v335_v56 = vpop.f32.mrb[9].mxu0 }
 0x101   :  { %557 = vst [vmem:[%s855_s4 + $0x10] sm:$0xff] %v541_v51  ;;  %v479_v57 = vmul.f32 %v791_v9, %v374_v55  ;;  %v478_v58 = vmul.f32 %v791_v9, %v335_v56  ;;  %v376_v59 = vpop.f32.mrb[9].mxu1  ;;  %v337_v60 = vpop.f32.mrb[10].mxu0 }
 0x102   :  { %558 = vst [vmem:[%s855_s4 + $0x18] sm:$0xff] %v542_v53  ;;  %v499_v61 = vadd.f32 %v793_v10, %v477_v54  ;;  %v480_v62 = vmul.f32 %v791_v9, %v376_v59  ;;  %v378_v63 = vpop.f32.mrb[10].mxu1  ;;  %v338_v1 = vpop.f32.mrb[11].mxu0 }
 0x103   :  { %v501_v2 = vadd.f32 %v793_v10, %v479_v57  ;;  %v500_v3 = vadd.f32 %v793_v10, %v478_v58  ;;  %v379_v4 = vpop.f32.mrb[11].mxu1 }
 0x104   :  { %v515_v6 = vmax.f32 %v499_v61, 0.0  ;;  %v502_v7 = vadd.f32 %v793_v10, %v480_v62 }
 0x105   :  { %v517_v8 = vmax.f32 %v501_v2, 0.0  ;;  %v516_v5 = vmax.f32 %v500_v3, 0.0 }
 0x106   :  { %v518_v11 = vmax.f32 %v502_v7, 0.0 }
 0x107   :  { %v543_v12 = vcombine.low %v515_v6, %v516_v5  ;;  %v415_v13 = vpop.f32.mrb[12].mxu0 }
 0x108   :  { %v544_v14 = vcombine.low %v517_v8, %v518_v11  ;;  %v481_v15 = vmul.f32 %v791_v9, %v415_v13  ;;  %v456_v0 = vpop.f32.mrb[12].mxu1  ;;  %v417_v16 = vpop.f32.mrb[13].mxu0 }
 0x109   :  { %559 = vst [vmem:[%s855_s4 + $0x20] sm:$0xff] %v543_v12  ;;  %v483_v17 = vmul.f32 %v791_v9, %v456_v0  ;;  %v482_v18 = vmul.f32 %v791_v9, %v417_v16  ;;  %v458_v19 = vpop.f32.mrb[13].mxu1  ;;  %v419_v20 = vpop.f32.mrb[14].mxu0 }
 0x10a   :  { %560 = vst [vmem:[%s855_s4 + $0x28] sm:$0xff] %v544_v14  ;;  %v503_v21 = vadd.f32 %v793_v10, %v481_v15  ;;  %v484_v22 = vmul.f32 %v791_v9, %v458_v19  ;;  %v460_v23 = vpop.f32.mrb[14].mxu1  ;;  %v420_v24 = vpop.f32.mrb[15].mxu0 }
 0x10b   :  { %v505_v25 = vadd.f32 %v793_v10, %v483_v17  ;;  %v504_v26 = vadd.f32 %v793_v10, %v482_v18  ;;  %v461_v27 = vpop.f32.mrb[15].mxu1 }
 0x10c   :  { %v519_v28 = vmax.f32 %v503_v21, 0.0  ;;  %v506_v29 = vadd.f32 %v793_v10, %v484_v22 }
 0x10d   :  { %v521_v30 = vmax.f32 %v505_v25, 0.0  ;;  %v520_v31 = vmax.f32 %v504_v26, 0.0 }
 0x10e   :  { %v522_v32 = vmax.f32 %v506_v29, 0.0 }
 0x10f   :  { %v545_v33 = vcombine.low %v519_v28, %v520_v31 }
 0x110   :  { %v546_v34 = vcombine.low %v521_v30, %v522_v32 }
 0x111   :  { %561 = vst [vmem:[%s855_s4 + $0x30] sm:$0xff] %v545_v33 }
 0x112   :  { %562 = vst [vmem:[%s855_s4 + $0x38] sm:$0xff] %v546_v34 }
 0x113   :  { %567 = vsyncpa [#allocation3], 1 }

// kernel: _lambda_.6
= control target key start
LH: loop header
LB: loop body
LE: loop exit
PB: predicated region body
PF: predicated region fallthrough
CT: control target
= control target key end

     0   :  { %v188_v3 = vmov 0   ;;  %vm55_vm0 = vcmask 1041408   ;;  %vm51_vm1 = vcmask 293888   ;;  %s299_s0 = inlined_call_operand.vmem [shape: f32[36,512], index: 0, kind: input, shape index: {}]   ;;  %s300_s2 = inlined_call_operand.vmem [shape: f32[8,1], index: 2, kind: input, shape index: {}]   ;;  %s301_s3 = inlined_call_operand.vmem [shape: f32[8,1], index: 3, kind: input, shape index: {}]   ;;  %s302_s1 = inlined_call_operand.vmem [shape: bf16[8,36], index: 1, kind: input, shape index: {}]   ;;  %s303_s4 = inlined_call_operand.vmem [shape: f32[8,512], index: 4, kind: output, shape index: {}]  }
   0x1   :  { %v20_v0 = vld [vmem:[%s299_s0 + $0x8] sm:$0xff]  ;;  %v22_v2 = vld [vmem:[%s299_s0 + $0x18] sm:$0xff]  ;;  %100 = vmatprep.mubr.bf16.mxu0 %v188_v3  ;;  %141 = vmatprep.mubr.bf16.mxu1 %v188_v3  ;;  %v19_v6 = vld [vmem:[%s299_s0] sm:$0xff] }
   0x2   :  { %v24_v1 = vld [vmem:[%s299_s0 + $0x28] sm:$0xff]  ;;  %v26_v5 = vld [vmem:[%s299_s0 + $0x38] sm:$0xff]  ;;  %v23_v7 = vld [vmem:[%s299_s0 + $0x20] sm:$0xff]  ;;  %187 = vset.pattern.permute.xlu0 %v188_v3 }
   0x3   :  { %v40_v4 = vpack.c.bf16 %v24_v1, %v20_v0  ;;  %v42_v8 = vpack.c.bf16 %v26_v5, %v22_v2  ;;  %v39_v9 = vpack.c.bf16 %v23_v7, %v19_v6  ;;  %v21_v10 = vld [vmem:[%s299_s0 + $0x10] sm:$0xff]  ;;  %v28_v12 = vld [vmem:[%s299_s0 + $0x48] sm:$0xff]  ;;  %v30_v15 = vld [vmem:[%s299_s0 + $0x58] sm:$0xff] }
   0x4   :  { %v25_v11 = vld [vmem:[%s299_s0 + $0x30] sm:$0xff]  ;;  %v32_v14 = vld [vmem:[%s299_s0 + $0x68] sm:$0xff]  ;;  %v34_v16 = vld [vmem:[%s299_s0 + $0x78] sm:$0xff] }
   0x5   :  { %68 = vmatprep.subr.bf16.mxu0 %v40_v4  ;;  %v41_v13 = vpack.c.bf16 %v25_v11, %v21_v10  ;;  %109 = vmatprep.subr.bf16.mxu1 %v42_v8  ;;  %v44_v17 = vpack.c.bf16 %v32_v14, %v28_v12  ;;  %v46_v18 = vpack.c.bf16 %v34_v16, %v30_v15  ;;  %v27_v19 = vld [vmem:[%s299_s0 + $0x40] sm:$0xff]  ;;  %v29_v21 = vld [vmem:[%s299_s0 + $0x50] sm:$0xff]  ;;  %v36_v24 = vld [vmem:[%s299_s0 + $0x88] sm:$0xf] }
   0x6   :  { %69 = vmatpush1.bf16.msra.mxu0 %v39_v9  ;;  %v31_v20 = vld [vmem:[%s299_s0 + $0x60] sm:$0xff]  ;;  %v33_v23 = vld [vmem:[%s299_s0 + $0x70] sm:$0xff]  ;;  %v38_v25 = vld [vmem:[%s299_s0 + $0x98] sm:$0xf]  ;;  %v48_v27 = vpack.c.bf16 %v36_v24, %v36_v24 }
   0x7   :  { %110 = vmatpush1.bf16.msra.mxu1 %v41_v13  ;;  %v43_v22 = vpack.c.bf16 %v31_v20, %v27_v19  ;;  %70 = vmatprep.subr.bf16.mxu0 %v44_v17  ;;  %v45_v26 = vpack.c.bf16 %v33_v23, %v29_v21  ;;  %v50_v28 = vpack.c.bf16 %v38_v25, %v38_v25  ;;  %v35_v29 = vld [vmem:[%s299_s0 + $0x80] sm:$0xf]  ;;  %v37_v30 = vld [vmem:[%s299_s0 + $0x90] sm:$0xf] }
   0x8   :  { %111 = vmatprep.subr.bf16.mxu1 %v46_v18  ;;  %v47_v31 = vpack.c.bf16 %v35_v29, %v35_v29  ;;  %v49_v32 = vpack.c.bf16 %v37_v30, %v37_v30  ;;  %v150_v33 = vld [vmem:[%s300_s2] sm:$0xff] }
   0x9   :  { %153 = vperm.xlu0 %187, %v150_v33   ;;  %v160_v35 = vld [vmem:[%s301_s3] sm:$0xff] }
   0xa   :  { %71 = vmatpush1.bf16.msra.mxu0 %v43_v22  ;;  %v57_v34 = vsel %vm55_vm0, %v47_v31, 0  ;;  %v63_v36 = vsel %vm55_vm0, %v49_v32, 0  ;;  %v18_v37 = vld [vmem:[%s302_s1] sm:$0xf] }
   0xb   :  { %112 = vmatpush1.bf16.msra.mxu1 %v45_v26  ;;  %182 = vmatprep.subr.msk.bf16.mxu0 %vm55_vm0, %v48_v27 }
   0xc   :  { %184 = vmatprep.subr.msk.bf16.mxu1 %vm55_vm0, %v50_v28 }
   0xd   :  { %163 = vperm.xlu0 %187, %v160_v35  }
   0xe   :  { %73 = vmatpush1.bf16.msra.mxu0 %v57_v34 }
   0xf   :  { %114 = vmatpush1.bf16.msra.mxu1 %v63_v36 }
  0x11   :  { %183 = vmatmul.mubr.msk.bf16.vlgmr.msra.gmra.mrb[0].mxu0 %vm51_vm1, %v18_v37 }
  0x12   :  { %185 = vmatmul.mubr.msk.bf16.vlgmr.msra.gmra.mrb[0].mxu1 %vm51_vm1, %v18_v37 }
  0x88   :  { %v154_v38 = vpop.permute.xlu0 %153 }
  0x8c   :  { %v164_v39 = vpop.permute.xlu0 %163 }
  0xe4   :  { %v102_v40 = vpop.f32.mrb[0].mxu0 }
  0xe5   :  { %v156_v41 = vmul.f32 %v154_v38, %v102_v40  ;;  %v143_v42 = vpop.f32.mrb[0].mxu1  ;;  %v104_v43 = vpop.f32.mrb[1].mxu0 }
  0xe6   :  { %v158_v44 = vmul.f32 %v154_v38, %v143_v42  ;;  %v157_v45 = vmul.f32 %v154_v38, %v104_v43  ;;  %v145_v46 = vpop.f32.mrb[1].mxu1  ;;  %v106_v47 = vpop.f32.mrb[2].mxu0 }
  0xe7   :  { %v166_v48 = vadd.f32 %v164_v39, %v156_v41  ;;  %v159_v49 = vmul.f32 %v154_v38, %v145_v46  ;;  %v147_v50 = vpop.f32.mrb[2].mxu1  ;;  %v107_v51 = vpop.f32.mrb[3].mxu0 }
  0xe8   :  { %v168_v52 = vadd.f32 %v164_v39, %v158_v44  ;;  %v167_v53 = vadd.f32 %v164_v39, %v157_v45  ;;  %v148_v54 = vpop.f32.mrb[3].mxu1 }
  0xe9   :  { %v170_v55 = vmax.f32 %v166_v48, 0.0  ;;  %v169_v56 = vadd.f32 %v164_v39, %v159_v49 }
  0xea   :  { %v172_v57 = vmax.f32 %v168_v52, 0.0  ;;  %v171_v58 = vmax.f32 %v167_v53, 0.0 }
  0xeb   :  { %174 = vst [vmem:[%s303_s4] sm:$0xff] %v170_v55  ;;  %v173_v59 = vmax.f32 %v169_v56, 0.0 }
  0xec   :  { %176 = vst [vmem:[%s303_s4 + $0x10] sm:$0xff] %v172_v57  ;;  %175 = vst [vmem:[%s303_s4 + $0x8] sm:$0xff] %v171_v58 }
  0xed   :  { %177 = vst [vmem:[%s303_s4 + $0x18] sm:$0xff] %v173_v59 }

// kernel: _lambda_.7
= control target key start
LH: loop header
LB: loop body
LE: loop exit
PB: predicated region body
PF: predicated region fallthrough
CT: control target
= control target key end

     0   :  { %vm26_vm0 = vcmask 1043456   ;;  %vm27_vm1 = vcmask 1044480   ;;  %v107_v0 = vmov 0.0   ;;  %v108_v3 = vmov 65535   ;;  %s154_s0 = inlined_call_operand.vmem [shape: f32[9,128], index: 0, kind: input, shape index: {}]   ;;  %s155_s2 = inlined_call_operand.vmem [shape: f32[4,1], index: 2, kind: input, shape index: {}]   ;;  %s156_s3 = inlined_call_operand.vmem [shape: f32[4,1], index: 3, kind: input, shape index: {}]   ;;  %s157_s1 = inlined_call_operand.vmem [shape: bf16[4,9], index: 1, kind: input, shape index: {}]   ;;  %s158_s4 = inlined_call_operand.vmem [shape: f32[4,128], index: 4, kind: output, shape index: {}]  }
   0x1   :  { %96 = vmatprep.subr.bf16.mxu0 %v107_v0  ;;  %v19_v1 = vld [vmem:[%s154_s0] sm:$0xff]  ;;  %v20_v2 = vld [vmem:[%s154_s0 + $0x8] sm:$0x1]  ;;  %v28_v4 = vsel %vm26_vm0, 4294967295, %v108_v3  ;;  %vm109_vm2 = vmmov 0   ;;  %v110_v8 = vmov 0  }
   0x2   :  { %v21_v5 = vpack.c.bf16 %v20_v2, %v19_v1  ;;  %v29_v6 = vsel %vm27_vm1, %v28_v4, 0  ;;  %98 = vmatprep.mubr.msk.bf16.mxu0 %vm109_vm2, %v107_v0  ;;  %v73_v7 = vld [vmem:[%s155_s2] sm:$0xf]  ;;  %106 = vset.pattern.permute.xlu0 %v110_v8  ;;  %vm22_vm3 = vcmask 72704  }
   0x3   :  { %76 = vperm.xlu0 %106, %v73_v7   ;;  %v80_v10 = vld [vmem:[%s156_s3] sm:$0xf] }
   0x4   :  { %v31_v9 = vand.u32 %v29_v6, %v21_v5  ;;  %v18_v11 = vld [vmem:[%s157_s1] sm:$0x3] }
   0x6   :  { %97 = vmatpush3.bf16.msra.mxu0 %v31_v9 }
   0x7   :  { %83 = vperm.xlu0 %106, %v80_v10  }
   0x9   :  { %99 = vmatmul.mubr.msk.bf16.vlgmr.msra.gmra.mrb[0].mxu0 %vm22_vm3, %v18_v11 }
  0x82   :  { %v77_v12 = vpop.permute.xlu0 %76 }
  0x86   :  { %v84_v16 = vpop.permute.xlu0 %83 }
  0xdc   :  { %v67_v13 = vpop.f32.mrb[0].mxu0 }
  0xdd   :  { %v79_v14 = vmul.f32 %v77_v12, %v67_v13  ;;  %v100_v15 = vpop.f32.mrb[1].mxu0 }
  0xde   :  { %v70_v17 = vpop.f32.mrb[2].mxu0 }
  0xdf   :  { %v86_v18 = vadd.f32 %v84_v16, %v79_v14  ;;  %v101_v19 = vpop.f32.mrb[3].mxu0 }
  0xe1   :  { %v87_v20 = vmax.f32 %v86_v18, 0.0 }
  0xe3   :  { %88 = vst [vmem:[%s158_s4] sm:$0xf] %v87_v20 }

// kernel: _lambda_.8
= control target key start
LH: loop header
LB: loop body
LE: loop exit
PB: predicated region body
PF: predicated region fallthrough
CT: control target
= control target key end

     0   :  { %v115_v0 = vmov 0.0   ;;  %vm116_vm0 = vmmov 0   ;;  %v117_v7 = vmov 0   ;;  %vm31_vm1 = vcmask 1041408   ;;  %s170_s0 = inlined_call_operand.vmem [shape: f32[36,20], index: 0, kind: input, shape index: {}]   ;;  %s171_s2 = inlined_call_operand.vmem [shape: f32[8,1], index: 2, kind: input, shape index: {}]   ;;  %s172_s3 = inlined_call_operand.vmem [shape: f32[8,1], index: 3, kind: input, shape index: {}]   ;;  %s173_s1 = inlined_call_operand.vmem [shape: bf16[8,36], index: 1, kind: input, shape index: {}]   ;;  %s174_s4 = inlined_call_operand.vmem [shape: f32[8,20], index: 4, kind: output, shape index: {}]  }
   0x1   :  { %101 = vmatprep.subr.bf16.mxu0 %v115_v0  ;;  %v19_v1 = vld [vmem:[%s170_s0] sm:$0xff]  ;;  %v20_v2 = vld [vmem:[%s170_s0 + $0x8] sm:$0xff]  ;;  %v21_v3 = vld [vmem:[%s170_s0 + $0x10] sm:$0xff]  ;;  %107 = vmatprep.mubr.msk.bf16.mxu0 %vm116_vm0, %v115_v0  ;;  %vm27_vm2 = vcmask 293888   ;;  %vm90_vm3 = vcmask 162816  }
   0x2   :  { %v24_v4 = vpack.c.bf16 %v20_v2, %v19_v1  ;;  %v22_v5 = vld [vmem:[%s170_s0 + $0x18] sm:$0xff]  ;;  %v23_v6 = vld [vmem:[%s170_s0 + $0x20] sm:$0xf]  ;;  %114 = vset.pattern.permute.xlu0 %v117_v7 }
   0x3   :  { %v75_v8 = vld [vmem:[%s171_s2] sm:$0xff]  ;;  %v25_v9 = vpack.c.bf16 %v22_v5, %v21_v3  ;;  %v26_v10 = vpack.c.bf16 %v23_v6, %v23_v6 }
   0x4   :  { %102 = vmatpush3.bf16.msra.mxu0 %v24_v4  ;;  %78 = vperm.xlu0 %114, %v75_v8   ;;  %v82_v11 = vld [vmem:[%s172_s3] sm:$0xff] }
   0x5   :  { %103 = vmatprep.subr.bf16.mxu0 %v115_v0  ;;  %v33_v12 = vsel %vm31_vm1, %v26_v10, 0  ;;  %v18_v13 = vld [vmem:[%s173_s1] sm:$0xf] }
   0x8   :  { %104 = vmatpush3.bf16.msra.mxu0 %v25_v9  ;;  %85 = vperm.xlu0 %114, %v82_v11  }
   0x9   :  { %105 = vmatprep.subr.bf16.mxu0 %v115_v0 }
   0xc   :  { %106 = vmatpush3.bf16.msra.mxu0 %v33_v12 }
   0xf   :  { %108 = vmatmul.mubr.msk.bf16.vlgmr.msra.gmra.mrb[0].mxu0 %vm27_vm2, %v18_v13 }
  0x83   :  { %v79_v14 = vpop.permute.xlu0 %78 }
  0x87   :  { %v86_v18 = vpop.permute.xlu0 %85 }
  0xe2   :  { %v69_v15 = vpop.f32.mrb[0].mxu0 }
  0xe3   :  { %v81_v16 = vmul.f32 %v79_v14, %v69_v15  ;;  %v109_v17 = vpop.f32.mrb[1].mxu0 }
  0xe4   :  { %v72_v19 = vpop.f32.mrb[2].mxu0 }
  0xe5   :  { %v88_v20 = vadd.f32 %v86_v18, %v81_v16  ;;  %v110_v21 = vpop.f32.mrb[3].mxu0 }
  0xe7   :  { %v89_v22 = vmax.f32 %v88_v20, 0.0 }
  0xe9   :  { %91 = vst.msk [vmem:[%s174_s4] sm:$0xff] %vm90_vm3, %v89_v22 }

// kernel: _lambda_.9
= control target key start
LH: loop header
LB: loop body
LE: loop exit
PB: predicated region body
PF: predicated region fallthrough
CT: control target
= control target key end

     0   :  { %v704_v2 = vmov 0   ;;  %vm94_vm0 = vcmask 261120   ;;  %s877_s0 = inlined_call_operand.vmem [shape: f32[2,32], index: 0, kind: input, shape index: {}]   ;;  %s878_s1 = inlined_call_operand.vmem [shape: bf16[32,512], index: 1, kind: input, shape index: {}]   ;;  %s879_s2 = inlined_call_operand.vmem [shape: f32[1,512], index: 2, kind: input, shape index: {}]   ;;  %s880_s3 = inlined_call_operand.vmem [shape: bf16[512,100], index: 3, kind: input, shape index: {}]   ;;  %s881_s4 = inlined_call_operand.vmem [shape: f32[1,100], index: 4, kind: input, shape index: {}]   ;;  %s882_s5 = inlined_call_operand.hbm [shape: f32[2,100], index: 5, kind: output, shape index: {}]  }
   0x1   :  { %v636_v0 = vld [vmem:[%s878_s1 + $0x4] ss:$16 sps:$4 sm:$0xff]   ;;  %v638_v1 = vld [vmem:[%s878_s1 + $0xc] ss:$16 sps:$4 sm:$0xff]   ;;  %130 = vmatprep.mubr.bf16.mxu0 %v704_v2  ;;  %171 = vmatprep.mubr.bf16.mxu1 %v704_v2  ;;  %v640_v3 = vld [vmem:[%s878_s1] ss:$16 sps:$4 sm:$0xff]  }
   0x2   :  { %98 = vmatprep.subr.bf16.mxu0 %v636_v0  ;;  %v641_v4 = vld [vmem:[%s878_s1 + $0x8] ss:$16 sps:$4 sm:$0xff]   ;;  %139 = vmatprep.subr.bf16.mxu1 %v638_v1  ;;  %v642_v5 = vld [vmem:[%s878_s1 + $0x24] ss:$16 sps:$4 sm:$0xff]   ;;  %v644_v6 = vld [vmem:[%s878_s1 + $0x2c] ss:$16 sps:$4 sm:$0xff]  }
   0x3   :  { %99 = vmatpush1.bf16.msra.mxu0 %v640_v3  ;;  %140 = vmatpush1.bf16.msra.mxu1 %v641_v4  ;;  %v646_v7 = vld [vmem:[%s878_s1 + $0x20] ss:$16 sps:$4 sm:$0xff]   ;;  %v647_v8 = vld [vmem:[%s878_s1 + $0x28] ss:$16 sps:$4 sm:$0xff]  }
   0x4   :  { %100 = vmatprep.subr.bf16.mxu0 %v642_v5  ;;  %v22_v9 = vld [vmem:[%s877_s0] sm:$0x3]  ;;  %141 = vmatprep.subr.bf16.mxu1 %v644_v6  ;;  %v652_v15 = vld [vmem:[%s880_s3 + $0x48] sm:$0xff]   ;;  %v656_v19 = vld [vmem:[%s880_s3 + $0x50] sm:$0xff]  }
   0x5   :  { %v648_v10 = vld [vmem:[%s880_s3 + $0x40] sm:$0xff]   ;;  %v23_v11 = vpack.c.bf16 %v22_v9, %v22_v9  ;;  %v653_v16 = vld [vmem:[%s880_s3 + $0xc8] sm:$0xff]   ;;  %v657_v20 = vld [vmem:[%s880_s3 + $0xd0] sm:$0xff]  }
   0x6   :  { %v649_v12 = vld [vmem:[%s880_s3 + $0xc0] sm:$0xff]   ;;  %v654_v17 = vld [vmem:[%s880_s3 + $0x8] sm:$0xff]   ;;  %v658_v21 = vld [vmem:[%s880_s3 + $0x10] sm:$0xff]  }
   0x7   :  { %101 = vmatpush1.bf16.msra.mxu0 %v646_v7  ;;  %142 = vmatpush1.bf16.msra.mxu1 %v647_v8  ;;  %v650_v13 = vld [vmem:[%s880_s3] sm:$0xff]   ;;  %v655_v18 = vld [vmem:[%s880_s3 + $0x88] sm:$0xff]   ;;  %v659_v22 = vld [vmem:[%s880_s3 + $0x90] sm:$0xff]  }
   0x8   :  { %590 = vmatprep.subr.bf16.mxu0 %v648_v10  ;;  %612 = vmatprep.subr.bf16.mxu1 %v649_v12  ;;  %v651_v14 = vld [vmem:[%s880_s3 + $0x80] sm:$0xff]   ;;  %v660_v23 = vld [vmem:[%s880_s3 + $0x58] sm:$0xff]   ;;  %v668_v31 = vld [vmem:[%s880_s3 + $0x68] sm:$0xff]  }
   0x9   :  { %v661_v24 = vld [vmem:[%s880_s3 + $0xd8] sm:$0xff]   ;;  %v664_v27 = vld [vmem:[%s880_s3 + $0x60] sm:$0xff]   ;;  %v669_v32 = vld [vmem:[%s880_s3 + $0xe8] sm:$0xff]  }
   0xa   :  { %555 = vmatmul.mubr.msk.bf16.vlgmr.msra.gmra.mrb[0].mxu0 %vm94_vm0, %v23_v11  ;;  %556 = vmatmul.mubr.msk.bf16.vlgmr.msra.gmra.mrb[0].mxu1 %vm94_vm0, %v23_v11  ;;  %v662_v25 = vld [vmem:[%s880_s3 + $0x18] sm:$0xff]   ;;  %v665_v28 = vld [vmem:[%s880_s3 + $0xe0] sm:$0xff]   ;;  %v670_v33 = vld [vmem:[%s880_s3 + $0x28] sm:$0xff]  }
   0xb   :  { %591 = vmatpush3.bf16.msra.mxu0 %v650_v13  ;;  %613 = vmatpush3.bf16.msra.mxu1 %v651_v14  ;;  %v663_v26 = vld [vmem:[%s880_s3 + $0x98] sm:$0xff]   ;;  %v666_v29 = vld [vmem:[%s880_s3 + $0x20] sm:$0xff]   ;;  %v671_v34 = vld [vmem:[%s880_s3 + $0xa8] sm:$0xff]  }
   0xc   :  { %592 = vmatprep.subr.bf16.mxu0 %v652_v15  ;;  %614 = vmatprep.subr.bf16.mxu1 %v653_v16  ;;  %v667_v30 = vld [vmem:[%s880_s3 + $0xa0] sm:$0xff]  }
   0xf   :  { %593 = vmatpush3.bf16.msra.mxu0 %v654_v17  ;;  %615 = vmatpush3.bf16.msra.mxu1 %v655_v18 }
  0x10   :  { %594 = vmatprep.subr.bf16.mxu0 %v656_v19  ;;  %616 = vmatprep.subr.bf16.mxu1 %v657_v20 }
  0x13   :  { %595 = vmatpush3.bf16.msra.mxu0 %v658_v21  ;;  %617 = vmatpush3.bf16.msra.mxu1 %v659_v22 }
  0x14   :  { %596 = vmatprep.subr.bf16.mxu0 %v660_v23  ;;  %618 = vmatprep.subr.bf16.mxu1 %v661_v24 }
  0x17   :  { %597 = vmatpush3.bf16.msra.mxu0 %v662_v25  ;;  %619 = vmatpush3.bf16.msra.mxu1 %v663_v26 }
  0x18   :  { %598 = vmatprep.subr.bf16.mxu0 %v664_v27  ;;  %620 = vmatprep.subr.bf16.mxu1 %v665_v28 }
  0x1b   :  { %599 = vmatpush3.bf16.msra.mxu0 %v666_v29  ;;  %621 = vmatpush3.bf16.msra.mxu1 %v667_v30 }
  0x1c   :  { %600 = vmatprep.subr.bf16.mxu0 %v668_v31  ;;  %622 = vmatprep.subr.bf16.mxu1 %v669_v32 }
  0x1f   :  { %601 = vmatpush3.bf16.msra.mxu0 %v670_v33  ;;  %623 = vmatpush3.bf16.msra.mxu1 %v671_v34 }
  0x20   :  { %10 = vsyncpa [#allocation3], 0  ;;  %v672_v35 = vld [vmem:[%s880_s3 + $0x70] sm:$0xff]   ;;  %v676_v39 = vld [vmem:[%s880_s3 + $0x78] sm:$0xff]   ;;  %v34_v43 = vlaneseq  ;;  %s705_s21 = smov [#allocation2]   ;;  %vm531_vm1 = vcmask 812032  }
  0x21   :  { %v673_v36 = vld [vmem:[%s880_s3 + $0xf0] sm:$0xff]   ;;  %602 = vmatprep.subr.bf16.mxu0 %v672_v35  ;;  %v677_v40 = vld [vmem:[%s880_s3 + $0xf8] sm:$0xff]   ;;  %v32_v47 = vld [vmem:[%s879_s2] sm:$0xf]  ;;  %s539_s22 = sshll.u32 %s705_s21, 4  ;;  %s540_s22 = int_to_ptr.vmem [resolvable:$true] %s539_s22 }
  0x22   :  { %v674_v37 = vld [vmem:[%s880_s3 + $0x30] sm:$0xff]   ;;  %624 = vmatprep.subr.bf16.mxu1 %v673_v36  ;;  %v678_v41 = vld [vmem:[%s880_s3 + $0x38] sm:$0xff]   ;;  %v35_v44 = vshrl.u32 %v34_v43, 7  ;;  %v557_v12 = vld [vmem:[%s881_s4] ss:$0 sm:$0xff]  ;;  %s680_s23 = scalar_lea.vmem %s540_s22, 32  ;;  %p685_p1 = scmp.lt.s32.totalorder %s540_s22, %s540_s22 }
  0x23   :  { %v675_v38 = vld [vmem:[%s880_s3 + $0xb0] sm:$0xff]   ;;  %603 = vmatpush3.bf16.msra.mxu0 %v674_v37  ;;  %v679_v42 = vld [vmem:[%s880_s3 + $0xb8] sm:$0xff]   ;;  %p681_p0 = scmp.ne.s32.totalorder %s540_s22, %s680_s23  ;;  %p686_p2 = scmp.lt.s32.totalorder %s680_s23, %s680_s23 }
  0x24   :  { %625 = vmatpush3.bf16.msra.mxu1 %v675_v38  ;;  %604 = vmatprep.subr.bf16.mxu0 %v676_v39  ;;  %v36_v45 = vsub.s32 0, %v35_v44  ;;  %v44_v46 = vsub.s32 2, %v35_v44  ;;  %v40_v48 = vsub.s32 1, %v35_v44  ;;  %v48_v49 = vsub.s32 3, %v35_v44 }
  0x25   :  { %626 = vmatprep.subr.bf16.mxu1 %v677_v40  ;;  %p687_p3 = por %p686_p2, %p685_p1 }
  0x26   :  { %v37_v50 = vrot.slane %v32_v47, %v36_v45  ;;  %v45_v51 = vrot.slane %v32_v47, %v44_v46  ;;  %v41_v52 = vrot.slane %v32_v47, %v40_v48  ;;  %v49_v53 = vrot.slane %v32_v47, %v48_v49 }
  0x27   :  { %605 = vmatpush3.bf16.msra.mxu0 %v678_v41  ;;  %p688_p4 = pnand %p687_p3, %p681_p0 }
  0x28   :  { %627 = vmatpush3.bf16.msra.mxu1 %v679_v42 }
  0xdd   :  { %v132_v54 = vpop.f32.mrb[0].mxu0  ;;  %v173_v55 = vpop.f32.mrb[0].mxu1 }
  0xde   :  { %v133_v56 = vadd.f32 %v132_v54, %v37_v50  ;;  %v174_v57 = vadd.f32 %v173_v55, %v45_v51  ;;  %v134_v58 = vpop.f32.mrb[1].mxu0  ;;  %v175_v59 = vpop.f32.mrb[1].mxu1 }
  0xdf   :  { %v135_v60 = vadd.f32 %v134_v58, %v41_v52  ;;  %v176_v61 = vadd.f32 %v175_v59, %v49_v53  ;;  %v136_v62 = vpop.f32.mrb[2].mxu0  ;;  %v177_v63 = vpop.f32.mrb[2].mxu1 }
  0xe0   :  { %v180_v0 = vmax.f32 %v133_v56, 0.0  ;;  %v182_v1 = vmax.f32 %v174_v57, 0.0  ;;  %v137_v2 = vpop.f32.mrb[3].mxu0  ;;  %v178_v3 = vpop.f32.mrb[3].mxu1 }
  0xe1   :  { %v181_v4 = vmax.f32 %v135_v60, 0.0  ;;  %v183_v5 = vmax.f32 %v176_v61, 0.0 }
  0xe2   :  { %v186_v6 = vpack.c.bf16 %v182_v1, %v182_v1  ;;  %v184_v9 = vpack.c.bf16 %v180_v0, %v180_v0 }
  0xe3   :  { %v185_v7 = vpack.c.bf16 %v181_v4, %v181_v4  ;;  %v187_v8 = vpack.c.bf16 %v183_v5, %v183_v5 }
  0xe5   :  { %483 = vmatprep.mubr.bf16.mxu0 %v185_v7  ;;  %523 = vmatprep.mubr.bf16.mxu1 %v187_v8 }
  0xe6   :  { %484 = vmatmul.mubr.bf16.vlgmr.msra.gmra.mrb[4].mxu0 %v184_v9  ;;  %524 = vmatmul.mubr.bf16.vlgmr.msra.gmra.mrb[4].mxu1 %v186_v6 }
 0x1b9   :  { %v606_v10 = vpop.f32.mrb[4].mxu0  ;;  %v628_v11 = vpop.f32.mrb[4].mxu1 }
 0x1ba   :  { %v607_v13 = vpop.f32.mrb[5].mxu0  ;;  %v629_v14 = vpop.f32.mrb[5].mxu1 }
 0x1bb   :  { %v608_v15 = vadd.f32 %v607_v13, %v606_v10  ;;  %v630_v16 = vadd.f32 %v629_v14, %v628_v11  ;;  %v609_v17 = vpop.f32.mrb[6].mxu0  ;;  %v631_v18 = vpop.f32.mrb[6].mxu1 }
 0x1bc   :  { %v610_v19 = vpop.f32.mrb[7].mxu0  ;;  %v632_v20 = vpop.f32.mrb[7].mxu1 }
 0x1bd   :  { %v486_v21 = vadd.f32 %v608_v15, %v557_v12 }
 0x1bf   :  { %v526_v22 = vadd.f32 %v630_v16, %v486_v21 }
 0x1c1   :  { %532 = vst.msk [vmem:[#allocation2] sm:$0x3] %vm531_vm1, %v526_v22 }
 0x1c2   :  { %691 = shalt.err (!%p688_p4)
}
 0x1c3   :  { %s692_s25 = scalar_lea.hbm %s882_s5, 32 }
 0x1c4   :  { %p693_p5 = scmp.ne.s32.totalorder %s882_s5, %s692_s25  ;;  %p696_p6 = scmp.lt.u32.totalorder %s692_s25, %s882_s5 }
 0x1c6   :  { %p698_p7 = pnand %p696_p6, %p693_p5 }
 0x1c8   :  { %701 = shalt.err (!%p698_p7)
}
 0x1c9   :  { %542 = dma.vmem_to_hbm [thread:$0]  %s540_s22, 32, %s882_s5, [#allocation3]  }
 0x1ca   :  { %702 = dma.done.wait [#allocation3], 32  }
 0x1cb   :  { %703 = vsyncadd [#allocation3], 4294967264 }
 0x1cc   :  { %546 = vsyncpa [#allocation3], 1 }

</bundles_post_ra>
